<compile_context>
chip_gen: v5e
topology: v5e:2x2
jax: 0.10.0
libtpu: 0.0.40
codegen_flags: <defaults>
</compile_context>

<pallas_src>
import functools

import jax
import jax.numpy as jnp
from jax.experimental import pallas as pl
from jax.experimental.pallas import tpu as pltpu


# ---------------------------------------------------------------------------
# Fused Pallas kernel: stem GEMM + head GEMM + avg-pool accumulate + Linear
# ---------------------------------------------------------------------------

def _fused_encoder_kernel(p_ref, w1_ref, b1_ref, w2_ref, b2_ref, w3_ref, b3_ref,
                          o_ref, acc_ref, *, tile_m, hw_valid, inv_hw, masked):
    s = pl.program_id(1)                       # spatial-tile (reduction) axis

    @pl.when(s == 0)
    def _init():
        acc_ref[...] = jnp.zeros_like(acc_ref)

    patches = p_ref[0]                                               # (tile_m, Kp) bf16
    stem = jnp.dot(patches, w1_ref[...], preferred_element_type=jnp.float32)
    stem = jnp.maximum(stem + b1_ref[...], 0.0)                      # (tile_m, c_stem) f32
    feat = jnp.dot(stem.astype(jnp.bfloat16), w2_ref[...],
                   preferred_element_type=jnp.float32)
    feat = jnp.maximum(feat + b2_ref[...], 0.0)                      # (tile_m, c_feat) f32

    if masked:  # zero rows that are only spatial padding (static Python flag)
        row = s * tile_m + jax.lax.broadcasted_iota(jnp.int32, (tile_m, 1), 0)
        feat = jnp.where(row < hw_valid, feat, 0.0)

    # running spatial sum for adaptive_avg_pool2d((1,1))
    acc_ref[...] += jnp.sum(feat, axis=0, keepdims=True)             # (1, c_feat)

    @pl.when(s == pl.num_programs(1) - 1)
    def _finalize():
        pooled = acc_ref[...] * inv_hw                               # mean over H*W
        out = jnp.dot(pooled.astype(jnp.bfloat16), w3_ref[...],
                      preferred_element_type=jnp.float32)
        o_ref[0] = out + b3_ref[...]                                 # (1, n_shape)


# ---------------------------------------------------------------------------
# JAX glue: im2col, parameter setup, forward
# ---------------------------------------------------------------------------

def _round_up(x, m):
    return ((x + m - 1) // m) * m


def im2col_nhwc(x_nhwc, kh, kw, stride, pad):
    x = jnp.pad(x_nhwc, ((0, 0), (pad, pad), (pad, pad), (0, 0)))
    B, H, W, C = x.shape
    Ho = (H - kh) // stride + 1
    Wo = (W - kw) // stride + 1
    taps = []
    for i in range(kh):
        for j in range(kw):
            taps.append(x[:, i:i + Ho * stride:stride, j:j + Wo * stride:stride, :])
    p = jnp.concatenate(taps, axis=-1)                # (B, Ho, Wo, kh*kw*C)
    return p.reshape(B, Ho * Wo, kh * kw * C), (Ho, Wo)


def init_params(key, c_in=3, c_stem=32, c_feat=128, n_shape=300):
    k1, k2 = jax.random.split(key)
    return {
        "stem_w": 0.1 * jax.random.normal(k1, (3 * 3 * c_in, c_stem), jnp.float32),
        "stem_b": jnp.zeros((c_stem,), jnp.float32),
        "head_w": 0.1 * jax.random.normal(k2, (c_stem, c_feat), jnp.float32),
        "head_b": jnp.zeros((c_feat,), jnp.float32),
        # ShapeEncoder.init_weights(): weight *= 0, bias *= 0  -> zeros.
        "shape_w": jnp.zeros((c_feat, n_shape), jnp.float32),
        "shape_b": jnp.zeros((n_shape,), jnp.float32),
    }


def shape_encoder_forward(img_nchw, params, *, tile_m=None):
    B = img_nchw.shape[0]
    x = jnp.transpose(img_nchw, (0, 2, 3, 1))                  # NCHW -> NHWC
    patches, (Ho, Wo) = im2col_nhwc(x, 3, 3, stride=2, pad=1)  # (B, Ho*Wo, Kp)
    hw = Ho * Wo
    Kp = patches.shape[-1]
    c_stem = params["stem_w"].shape[1]
    c_feat = params["head_w"].shape[1]
    n_shape = params["shape_w"].shape[1]

    # Tile the spatial (M) axis; keep tiles multiple-of-16 for bf16 sublanes.
    if tile_m is None:
        tile_m = min(512, _round_up(hw, 16))      # sweepable; small on v7x VMEM
    tile_m = max(16, _round_up(tile_m, 16))
    m_pad = _round_up(hw, tile_m)
    if m_pad != hw:
        patches = jnp.pad(patches, ((0, 0), (0, m_pad - hw), (0, 0)))
    num_s = m_pad // tile_m

    # bf16 MXU operands, f32 biases / accumulation.
    p_bf = patches.astype(jnp.bfloat16)
    w1 = params["stem_w"].astype(jnp.bfloat16)
    b1 = params["stem_b"].reshape(1, c_stem).astype(jnp.float32)
    w2 = params["head_w"].astype(jnp.bfloat16)
    b2 = params["head_b"].reshape(1, c_feat).astype(jnp.float32)
    w3 = params["shape_w"].astype(jnp.bfloat16)
    b3 = params["shape_b"].reshape(1, n_shape).astype(jnp.float32)

    kernel = functools.partial(
        _fused_encoder_kernel,
        tile_m=tile_m, hw_valid=hw, inv_hw=1.0 / hw, masked=(m_pad != hw))

    grid_spec = pltpu.PrefetchScalarGridSpec(
        num_scalar_prefetch=0,
        grid=(B, num_s),
        in_specs=[
            pl.BlockSpec((1, tile_m, Kp), lambda b, s: (b, s, 0)),    # patch tiles
            pl.BlockSpec((Kp, c_stem),    lambda b, s: (0, 0)),       # resident weights
            pl.BlockSpec((1, c_stem),     lambda b, s: (0, 0)),
            pl.BlockSpec((c_stem, c_feat), lambda b, s: (0, 0)),
            pl.BlockSpec((1, c_feat),     lambda b, s: (0, 0)),
            pl.BlockSpec((c_feat, n_shape), lambda b, s: (0, 0)),
            pl.BlockSpec((1, n_shape),    lambda b, s: (0, 0)),
        ],
        out_specs=pl.BlockSpec((1, 1, n_shape), lambda b, s: (b, 0, 0)),
        scratch_shapes=[pltpu.VMEM((1, c_feat), jnp.float32)],
    )

    flops = 2 * B * m_pad * (Kp * c_stem + c_stem * c_feat) + 2 * B * c_feat * n_shape
    bytes_accessed = (p_bf.size * 2 + w1.size * 2 + w2.size * 2 + w3.size * 2
                      + b1.size * 4 + b2.size * 4 + b3.size * 4 + B * n_shape * 4)

    out = pl.pallas_call(
        kernel,
        out_shape=jax.ShapeDtypeStruct((B, 1, n_shape), jnp.float32),
        grid_spec=grid_spec,
        compiler_params=pltpu.CompilerParams(
            dimension_semantics=("parallel", "arbitrary")),
        cost_estimate=pl.CostEstimate(flops=flops, transcendentals=0,
                                      bytes_accessed=bytes_accessed),
    )(p_bf, w1, b1, w2, b2, w3, b3)
    return out.reshape(B, n_shape)


def shape_encoder_reference(img_nchw, params):
    """Pure-JAX reference using the same bf16-operand / f32-accum math."""
    x = jnp.transpose(img_nchw, (0, 2, 3, 1))
    patches, _ = im2col_nhwc(x, 3, 3, stride=2, pad=1)
    p = patches.astype(jnp.bfloat16)
    stem = jnp.maximum(
        jnp.einsum("bmk,kc->bmc", p, params["stem_w"].astype(jnp.bfloat16),
                   preferred_element_type=jnp.float32) + params["stem_b"], 0.0)
    feat = jnp.maximum(
        jnp.einsum("bmc,cf->bmf", stem.astype(jnp.bfloat16),
                   params["head_w"].astype(jnp.bfloat16),
                   preferred_element_type=jnp.float32) + params["head_b"], 0.0)
    pooled = jnp.mean(feat, axis=1)
    out = jnp.dot(pooled.astype(jnp.bfloat16),
                  params["shape_w"].astype(jnp.bfloat16),
                  preferred_element_type=jnp.float32) + params["shape_b"]
    return out


# ---------------------------------------------------------------------------
# Driver
# ---------------------------------------------------------------------------

if __name__ == "__main__":
    key = jax.random.PRNGKey(0)
    k_img, k_par, k_w, k_b = jax.random.split(key, 4)

    B, C_in, H, W = 2, 3, 16, 16
    n_shape = 300
    img = jax.random.normal(k_img, (B, C_in, H, W), jnp.float32)   # NCHW like PyTorch

    params = init_params(k_par, c_in=C_in, c_stem=32, c_feat=128, n_shape=n_shape)

    fwd = jax.jit(shape_encoder_forward, static_argnames=("tile_m",))

    # Faithful run: zero-init shape head -> output must be exactly zero.
    out = jax.block_until_ready(fwd(img, params, tile_m=32))
    assert out.shape == (B, n_shape), out.shape
    assert jnp.allclose(out, 0.0), "expected zero output from zero-init head"

    # Non-zero-head validation against a pure-JAX reference (exercises the
    # fused GEMM / pooling / linear path, multiple spatial tiles via tile_m=32).
    params_t = dict(params)
    params_t["shape_w"] = 0.05 * jax.random.normal(k_w, (128, n_shape), jnp.float32)
    params_t["shape_b"] = 0.01 * jax.random.normal(k_b, (n_shape,), jnp.float32)
    out_t = jax.block_until_ready(fwd(img, params_t, tile_m=32))
    ref_t = shape_encoder_reference(img, params_t)
    assert jnp.allclose(out_t, ref_t, rtol=2e-2, atol=2e-2), (
        float(jnp.max(jnp.abs(out_t - ref_t))))

    print("KERNEL_OK")
</pallas_src>

<mosaic_0001>
module attributes {stable_mosaic.version = 11 : i64} {
  func.func @_fused_encoder_kernel(%arg0: i32, %arg1: i32, %arg2: memref<1x32x27xbf16, #tpu.memory_space<vmem>>, %arg3: memref<27x32xbf16, #tpu.memory_space<vmem>>, %arg4: memref<1x32xf32, #tpu.memory_space<vmem>>, %arg5: memref<32x128xbf16, #tpu.memory_space<vmem>>, %arg6: memref<1x128xf32, #tpu.memory_space<vmem>>, %arg7: memref<128x300xbf16, #tpu.memory_space<vmem>>, %arg8: memref<1x300xf32, #tpu.memory_space<vmem>>, %arg9: memref<1x1x300xf32, #tpu.memory_space<vmem>>, %arg10: memref<1x128xf32, #tpu.memory_space<vmem>>) attributes {dimension_semantics = [#tpu.dimension_semantics<parallel>, #tpu.dimension_semantics<arbitrary>], iteration_bounds = array<i64: 2, 2>, scalar_prefetch = 0 : i64, scratch_operands = 1 : i64, tpu.core_type = #tpu.core_type<tc>, window_params = [{transform_indices = @transform_0, window_bounds = array<i64: 1, 32, 27>}, {pipeline_mode = #tpu.pipeline_mode<synchronous>, transform_indices = @transform_1, window_bounds = array<i64: 27, 32>}, {pipeline_mode = #tpu.pipeline_mode<synchronous>, transform_indices = @transform_2, window_bounds = array<i64: 1, 32>}, {pipeline_mode = #tpu.pipeline_mode<synchronous>, transform_indices = @transform_3, window_bounds = array<i64: 32, 128>}, {pipeline_mode = #tpu.pipeline_mode<synchronous>, transform_indices = @transform_4, window_bounds = array<i64: 1, 128>}, {pipeline_mode = #tpu.pipeline_mode<synchronous>, transform_indices = @transform_5, window_bounds = array<i64: 128, 300>}, {pipeline_mode = #tpu.pipeline_mode<synchronous>, transform_indices = @transform_6, window_bounds = array<i64: 1, 300>}, {transform_indices = @transform_7, window_bounds = array<i64: 1, 1, 300>}]} {
    %c0_i32 = arith.constant 0 : i32
    %0 = arith.cmpi eq, %arg1, %c0_i32 : i32
    %1 = arith.extui %0 : i1 to i32
    %c0_i32_0 = arith.constant 0 : i32
    %2 = arith.cmpi ne, %1, %c0_i32_0 : i32
    scf.if %2 {
      %cst_20 = arith.constant 0.000000e+00 : f32
      %28 = vector.broadcast %cst_20 : f32 to vector<1x128xf32>
      %c0_21 = arith.constant 0 : index
      %c0_22 = arith.constant 0 : index
      %29 = vector.load %arg10[%c0_21, %c0_22] : memref<1x128xf32, #tpu.memory_space<vmem>>, vector<1x128xf32>
      tpu.vector_store %arg10[%c0_21, %c0_22], %28 {strides = array<i32>} : memref<1x128xf32, #tpu.memory_space<vmem>>, vector<1x128xf32>,
    } else {
    }
    %c0 = arith.constant 0 : index
    %c0_1 = arith.constant 0 : index
    %c0_2 = arith.constant 0 : index
    %3 = vector.load %arg2[%c0, %c0_1, %c0_2] : memref<1x32x27xbf16, #tpu.memory_space<vmem>>, vector<1x32x27xbf16>
    %4 = vector.shape_cast %3 : vector<1x32x27xbf16> to vector<32x27xbf16>
    %c0_3 = arith.constant 0 : index
    %c0_4 = arith.constant 0 : index
    %5 = vector.load %arg3[%c0_3, %c0_4] : memref<27x32xbf16, #tpu.memory_space<vmem>>, vector<27x32xbf16>
    %cst = arith.constant dense<0.000000e+00> : vector<32x32xf32>
    %6 = tpu.matmul %4, %5, %cst {dimension_numbers = #tpu.dot_dimension_numbers<[1], [0], [0], [1], [0, 0, 1, 1], [], []>} : vector<32x27xbf16>, vector<27x32xbf16>, vector<32x32xf32> -> vector<32x32xf32>
    %c0_5 = arith.constant 0 : index
    %c0_6 = arith.constant 0 : index
    %7 = vector.load %arg4[%c0_5, %c0_6] : memref<1x32xf32, #tpu.memory_space<vmem>>, vector<1x32xf32>
    %8 = vector.broadcast %7 : vector<1x32xf32> to vector<32x32xf32>
    %9 = arith.addf %6, %8 : vector<32x32xf32>
    %cst_7 = arith.constant 0.000000e+00 : f32
    %10 = vector.broadcast %cst_7 : f32 to vector<32x32xf32>
    %11 = arith.maximumf %9, %10 : vector<32x32xf32>
    %12 = arith.truncf %11 : vector<32x32xf32> to vector<32x32xbf16>
    %c0_8 = arith.constant 0 : index
    %c0_9 = arith.constant 0 : index
    %13 = vector.load %arg5[%c0_8, %c0_9] : memref<32x128xbf16, #tpu.memory_space<vmem>>, vector<32x128xbf16>
    %cst_10 = arith.constant dense<0.000000e+00> : vector<32x128xf32>
    %14 = tpu.matmul %12, %13, %cst_10 {dimension_numbers = #tpu.dot_dimension_numbers<[1], [0], [0], [1], [0, 0, 1, 1], [], []>} : vector<32x32xbf16>, vector<32x128xbf16>, vector<32x128xf32> -> vector<32x128xf32>
    %c0_11 = arith.constant 0 : index
    %c0_12 = arith.constant 0 : index
    %15 = vector.load %arg6[%c0_11, %c0_12] : memref<1x128xf32, #tpu.memory_space<vmem>>, vector<1x128xf32>
    %16 = vector.broadcast %15 : vector<1x128xf32> to vector<32x128xf32>
    %17 = arith.addf %14, %16 : vector<32x128xf32>
    %cst_13 = arith.constant 0.000000e+00 : f32
    %18 = vector.broadcast %cst_13 : f32 to vector<32x128xf32>
    %19 = arith.maximumf %17, %18 : vector<32x128xf32>
    %c0_14 = arith.constant 0 : index
    %c0_15 = arith.constant 0 : index
    %20 = vector.load %arg10[%c0_14, %c0_15] : memref<1x128xf32, #tpu.memory_space<vmem>>, vector<1x128xf32>
    %cst_16 = arith.constant dense<0.000000e+00> : vector<128xf32>
    %21 = vector.multi_reduction <add>, %19, %cst_16 [0] : vector<32x128xf32> to vector<128xf32>
    %22 = vector.shape_cast %21 : vector<128xf32> to vector<1x128xf32>
    %23 = arith.addf %20, %22 : vector<1x128xf32>
    %c0_17 = arith.constant 0 : index
    %c0_18 = arith.constant 0 : index
    %24 = vector.load %arg10[%c0_17, %c0_18] : memref<1x128xf32, #tpu.memory_space<vmem>>, vector<1x128xf32>
    tpu.vector_store %arg10[%c0_17, %c0_18], %23 {strides = array<i32>} : memref<1x128xf32, #tpu.memory_space<vmem>>, vector<1x128xf32>,
    %c1_i32 = arith.constant 1 : i32
    %25 = arith.cmpi eq, %arg1, %c1_i32 : i32
    %26 = arith.extui %25 : i1 to i32
    %c0_i32_19 = arith.constant 0 : i32
    %27 = arith.cmpi ne, %26, %c0_i32_19 : i32
    scf.if %27 {
      %c0_20 = arith.constant 0 : index
      %c0_21 = arith.constant 0 : index
      %28 = vector.load %arg10[%c0_20, %c0_21] : memref<1x128xf32, #tpu.memory_space<vmem>>, vector<1x128xf32>
      %cst_22 = arith.constant 1.562500e-02 : f32
      %29 = vector.broadcast %cst_22 : f32 to vector<1x128xf32>
      %30 = arith.mulf %28, %29 : vector<1x128xf32>
      %31 = arith.truncf %30 : vector<1x128xf32> to vector<1x128xbf16>
      %c0_23 = arith.constant 0 : index
      %c0_24 = arith.constant 0 : index
      %32 = vector.load %arg7[%c0_23, %c0_24] : memref<128x300xbf16, #tpu.memory_space<vmem>>, vector<128x300xbf16>
      %cst_25 = arith.constant dense<0.000000e+00> : vector<1x300xf32>
      %33 = tpu.matmul %31, %32, %cst_25 {dimension_numbers = #tpu.dot_dimension_numbers<[1], [0], [0], [1], [0, 0, 1, 1], [], []>} : vector<1x128xbf16>, vector<128x300xbf16>, vector<1x300xf32> -> vector<1x300xf32>
      %c0_26 = arith.constant 0 : index
      %c0_27 = arith.constant 0 : index
      %34 = vector.load %arg8[%c0_26, %c0_27] : memref<1x300xf32, #tpu.memory_space<vmem>>, vector<1x300xf32>
      %35 = arith.addf %33, %34 : vector<1x300xf32>
      %c0_28 = arith.constant 0 : index
      %c0_29 = arith.constant 0 : index
      %c0_30 = arith.constant 0 : index
      %36 = vector.load %arg9[%c0_28, %c0_29, %c0_30] : memref<1x1x300xf32, #tpu.memory_space<vmem>>, vector<1x1x300xf32>
      %37 = vector.shape_cast %36 : vector<1x1x300xf32> to vector<1x300xf32>
      %38 = vector.shape_cast %35 : vector<1x300xf32> to vector<1x1x300xf32>
      tpu.vector_store %arg9[%c0_28, %c0_29, %c0_30], %38 {strides = array<i32>} : memref<1x1x300xf32, #tpu.memory_space<vmem>>, vector<1x1x300xf32>,
    } else {
    }
    return
  }
  func.func @transform_0(%arg0: i32, %arg1: i32) -> (i32, i32, i32) {
    %c0_i32 = arith.constant 0 : i32
    %c0_i32_0 = arith.constant 0 : i32
    return %arg0, %arg1, %c0_i32 : i32, i32, i32
  }
  func.func @transform_1(%arg0: i32, %arg1: i32) -> (i32, i32) {
    %c0_i32 = arith.constant 0 : i32
    %c0_i32_0 = arith.constant 0 : i32
    %c0_i32_1 = arith.constant 0 : i32
    return %c0_i32, %c0_i32_0 : i32, i32
  }
  func.func @transform_2(%arg0: i32, %arg1: i32) -> (i32, i32) {
    %c0_i32 = arith.constant 0 : i32
    %c0_i32_0 = arith.constant 0 : i32
    %c0_i32_1 = arith.constant 0 : i32
    return %c0_i32, %c0_i32_0 : i32, i32
  }
  func.func @transform_3(%arg0: i32, %arg1: i32) -> (i32, i32) {
    %c0_i32 = arith.constant 0 : i32
    %c0_i32_0 = arith.constant 0 : i32
    %c0_i32_1 = arith.constant 0 : i32
    return %c0_i32, %c0_i32_0 : i32, i32
  }
  func.func @transform_4(%arg0: i32, %arg1: i32) -> (i32, i32) {
    %c0_i32 = arith.constant 0 : i32
    %c0_i32_0 = arith.constant 0 : i32
    %c0_i32_1 = arith.constant 0 : i32
    return %c0_i32, %c0_i32_0 : i32, i32
  }
  func.func @transform_5(%arg0: i32, %arg1: i32) -> (i32, i32) {
    %c0_i32 = arith.constant 0 : i32
    %c0_i32_0 = arith.constant 0 : i32
    %c0_i32_1 = arith.constant 0 : i32
    return %c0_i32, %c0_i32_0 : i32, i32
  }
  func.func @transform_6(%arg0: i32, %arg1: i32) -> (i32, i32) {
    %c0_i32 = arith.constant 0 : i32
    %c0_i32_0 = arith.constant 0 : i32
    %c0_i32_1 = arith.constant 0 : i32
    return %c0_i32, %c0_i32_0 : i32, i32
  }
  func.func @transform_7(%arg0: i32, %arg1: i32) -> (i32, i32, i32) {
    %c0_i32 = arith.constant 0 : i32
    %c0_i32_0 = arith.constant 0 : i32
    %c0_i32_1 = arith.constant 0 : i32
    return %arg0, %c0_i32, %c0_i32_0 : i32, i32, i32
  }
}

</mosaic_0001>

<bundles_post_ra>
// kernel: shape_encoder_forward.1
= control target key start
LH: loop header
LB: loop body
LE: loop exit
PB: predicated region body
PF: predicated region fallthrough
CT: control target
= control target key end

     0   :  { %s1041_s24 = smov 0   ;;  %s1043_s25 = smov 0   ;;  %s1268_s0 = inlined_call_operand.vmem [shape: bf16[2,64,27], index: 0, kind: input, shape index: {}]   ;;  %s1269_s1 = inlined_call_operand.vmem [shape: bf16[27,32], index: 1, kind: input, shape index: {}]   ;;  %s1270_s2 = inlined_call_operand.vmem [shape: f32[1,32], index: 2, kind: input, shape index: {}]   ;;  %s1271_s3 = inlined_call_operand.vmem [shape: bf16[32,128], index: 3, kind: input, shape index: {}]   ;;  %s1272_s4 = inlined_call_operand.vmem [shape: f32[1,128], index: 4, kind: input, shape index: {}]   ;;  %s1273_s5 = inlined_call_operand.vmem [shape: bf16[128,300], index: 5, kind: input, shape index: {}]   ;;  %s1274_s6 = inlined_call_operand.vmem [shape: f32[1,300], index: 6, kind: input, shape index: {}]   ;;  %s1275_s7 = inlined_call_operand.vmem [shape: f32[2,1,300], index: 7, kind: output, shape index: {}]  }
   0x1   :  { %s1045_s26 = smov 0   ;;  %s1047_s27 = smov 0  }
   0x2   :  { %s1049_s28 = smov 0  }
   0x3 LB: > { %s26_s29 = sadd.s32 1, %s989_s26  ;;  %s29_s30 = sadd.s32 1, %s993_s27  ;;  %s997_s28 = sphi %s1049_s28, %s17_s28   ;;  %s993_s27 = sphi %s1047_s27, %s1279_s27   ;;  %s989_s26 = sphi %s1045_s26, %s1278_s26   ;;  %s985_s25 = sphi %s1043_s25, %s1277_s25   ;;  %s981_s24 = sphi %s1041_s24, %s1276_s24  }
   0x4   : > { %p27_p0 = scmp.ge.s32.totalorder %s26_s29, 2  ;;  %p748_p1 = scmp.ge.s32.totalorder %s997_s28, 1 }
   0x5   : > { %p256_p2 = scmp.lt.s32.totalorder %s997_s28, 5 }
   0x6   : > { %s1281_s29 = smov (%p27_p0, %s26_s29), 0  ;;  %s1283_s30 = smov (!%p27_p0, %s29_s30), %s993_s27 }
   0x7   : > { %p257_p3 = pnand %p748_p1, %p256_p2  ;;  %p31_p4 = scmp.ge.s32.totalorder %s1283_s30, 2 }
   0x8   : > { %s749_s8 = sshll.u32 (!%p257_p3), %s981_s24, 2  ;;  %p292_p5 = scmp.lt.s32.totalorder (!%p257_p3), %s985_s25, 1 }
   0x9   : > { %s1285_s30 = smov (%p31_p4, %s1283_s30), 0  ;;  %260 = sbr.rel (%p257_p3) target bundleno = 518 (0x206), region = 48 }
   0xa   : > { %p294_p6 = scmp.lt.s32.totalorder (!%p257_p3), %s749_s8, 7  ;;  %p752_p7 = scmp.ne.s32.totalorder (!%p257_p3), %s981_s24, 0 }
   0xe   : > { %s1287_s25 = smov (!%p292_p5, %s985_s25), 1  ;;  %s1289_s8 = smov (!%p294_p6, %s749_s8), 7 }
   0xf   : > { %s750_s9 = sshll.u32 %s1287_s25, 3  ;;  %s914_s10 = smul.u32 3, %s1287_s25 }
  0x10   : > { %s297_s11 = sadd.s32 %s750_s9, %s1289_s8  ;;  %309 = sbr.rel (%p752_p7) target bundleno = 23 (0x17), region = 52 }
  0x11   : > { %s751_s12 = sshll.u32 %s297_s11, 2  ;;  %s1077_s15 = scalar_lea.vmem %s1275_s7, %s914_s10 }
  0x12   : > { %s299_s18 = scalar_lea.vmem %s1268_s0, %s751_s12 }
  0x15   : > { %v999_v0 = vmov 0.0  }
  0x16   : > { %310 = vst [vmem:[#allocation2] sm:$0x1] %v999_v0 }
  0x17 PF: > { %v767_v1 = vld [vmem:[%s1269_s1 + $0x8] sm:$0xf]  ;;  %v883_v2 = vld [vmem:[%s1269_s1 + $0x8] sm:$0x30]  ;;  %vm351_vm0 = vcmask 1044480   ;;  %vm352_vm1 = vcmask 1045504  }
  0x18   : > { %v768_v3 = vor.u32 %v883_v2, %v767_v1  ;;  %v1000_v4 = vmov 65535   ;;  %v882_v8 = vld [vmem:[%s1269_s1] sm:$0xff]  ;;  %v881_v10 = vld [vmem:[%s299_s18 + $0x8] sm:$0xff]  ;;  %vm344_vm2 = vcmask 220160   ;;  %vm403_vm3 = vcmask 261120   ;;  %p781_p8 = scmp.ne.s32.totalorder %s981_s24, 1 }
  0x19   : > { %v353_v5 = vsel %vm351_vm0, 4294967295, %v1000_v4  ;;  %v880_v9 = vld [vmem:[%s299_s18] sm:$0xff]  ;;  %v885_v11 = vld [vmem:[%s1271_s3 + $0x8] sm:$0xff] }
  0x1a   : > { %v354_v6 = vsel %vm352_vm1, %v353_v5, 0  ;;  %416 = vmatpush.bf16.msra.mxu1 %v885_v11  ;;  %912 = vmatpush.bf16.msra.mxu3 %v885_v11  ;;  %v884_v12 = vld [vmem:[%s1271_s3] sm:$0xff] }
  0x1b   : > { %v356_v7 = vand.u32 %v768_v3, %v354_v6  ;;  %v957_v14 = vld [vmem:[%s1270_s2] ss:$0 sm:$0xff] }
  0x1c   : > { %v958_v30 = vld [vmem:[%s1272_s4] ss:$0 sm:$0xff] }
  0x1d   : > { %364 = vmatpush.bf16.msra.mxu0 %v356_v7  ;;  %910 = vmatpush.bf16.msra.mxu2 %v356_v7  ;;  %v433_v49 = vld [vmem:[#allocation2] sm:$0x1] }
  0x1e   : > { %417 = vmatpush.bf16.msra.mxu1 %v884_v12  ;;  %913 = vmatpush.bf16.msra.mxu3 %v884_v12 }
  0x21   : > { %365 = vmatpush.bf16.msra.mxu0 %v882_v8  ;;  %911 = vmatpush.bf16.msra.mxu2 %v882_v8 }
  0x24   : > { %769 = vmatmul.msk.bf16.vlgmr.msra.gmra.mxu0 %vm344_vm2, %v880_v9  ;;  %770 = vmatmul.msk.bf16.vlgmr.msra.gmra.mxu2 %vm344_vm2, %v881_v10 }
  0xa1   : > { %v367_v13 = vpop.f32.mrf.mxu0 }
  0xa2   : > { %v368_v15 = vadd.f32 %v957_v14, %v367_v13 }
  0xa4   : > { %v377_v18 = vmax.f32 %v368_v15, 0.0 }
  0xa7   : > { %v372_v16 = vpop.f32.mrf.mxu2 }
  0xa8   : > { %v373_v21 = vadd.f32 %v957_v14, %v372_v16 }
  0xa9   : > { %v369_v17 = vpop.f32.mrf.mxu0 }
  0xaa   : > { %v370_v19 = vadd.f32 %v957_v14, %v369_v17  ;;  %v379_v25 = vmax.f32 %v373_v21, 0.0 }
  0xac   : > { %v378_v20 = vmax.f32 %v370_v19, 0.0 }
  0xae   : > { %v381_v22 = vpack.c.bf16 %v378_v20, %v377_v18 }
  0xaf   : > { %v374_v23 = vpop.f32.mrf.mxu2 }
  0xb0   : > { %v375_v24 = vadd.f32 %v957_v14, %v374_v23  ;;  %779 = vmatmul.msk.bf16.vlgmr.msra.gmra.mxu1 %vm403_vm3, %v381_v22 }
  0xb2   : > { %v380_v26 = vmax.f32 %v375_v24, 0.0 }
  0xb4   : > { %v382_v27 = vpack.c.bf16 %v380_v26, %v379_v25 }
  0xb6   : > { %780 = vmatmul.msk.bf16.vlgmr.msra.gmra.mxu3 %vm403_vm3, %v382_v27 }
 0x12d   : > { %v419_v28 = vpop.f32.mrf.mxu1 }
 0x12e   : > { %v420_v33 = vadd.f32 %v958_v30, %v419_v28 }
 0x130   : > { %v429_v36 = vmax.f32 %v420_v33, 0.0 }
 0x135   : > { %v421_v29 = vpop.f32.mrf.mxu1 }
 0x136   : > { %v422_v32 = vadd.f32 %v958_v30, %v421_v29 }
 0x138   : > { %v430_v35 = vmax.f32 %v422_v32, 0.0 }
 0x139   : > { %v424_v31 = vpop.f32.mrf.mxu3 }
 0x13a   : > { %v425_v34 = vadd.f32 %v958_v30, %v424_v31  ;;  %v434_v39 = vadd.f32 %v430_v35, %v429_v36 }
 0x13c   : > { %v431_v37 = vmax.f32 %v425_v34, 0.0 }
 0x13e   : > { %v435_v41 = vadd.f32 %v434_v39, %v431_v37 }
 0x141   : > { %v426_v38 = vpop.f32.mrf.mxu3 }
 0x142   : > { %v427_v40 = vadd.f32 %v958_v30, %v426_v38 }
 0x144   : > { %v432_v42 = vmax.f32 %v427_v40, 0.0 }
 0x146   : > { %v436_v43 = vadd.f32 %v435_v41, %v432_v42 }
 0x148   : > { %v437_v44 = vrot.slane %v436_v43, 4 }
 0x14a   : > { %v438_v45 = vadd.f32 %v437_v44, %v436_v43 }
 0x14c   : > { %v439_v46 = vrot.slane %v438_v45, 2 }
 0x14e   : > { %v440_v47 = vadd.f32 %v439_v46, %v438_v45 }
 0x150   : > { %v441_v48 = vrot.slane %v440_v47, 1 }
 0x152   : > { %v442_v50 = vadd.f32 %v441_v48, %v440_v47  ;;  %448 = sbr.rel (%p781_p8) target bundleno = 518 (0x206), region = 56 }
 0x154   : > { %v443_v51 = vadd.f32 %v442_v50, %v433_v49 }
 0x156   : > { %444 = vst [vmem:[#allocation2] sm:$0x1] %v443_v51 }
 0x157   : > { %v868_v52 = vld [vmem:[%s1273_s5 + $0xa8] sm:$0xf]  ;;  %v908_v53 = vld [vmem:[%s1273_s5 + $0xb0] sm:$0xf0]  ;;  %v907_v54 = vld [vmem:[%s1273_s5 + $0xac] sm:$0xf] }
 0x158   : > { %v869_v55 = vor.u32 %v908_v53, %v868_v52  ;;  %v870_v56 = vld [vmem:[%s1273_s5 + $0xb4] sm:$0xf0]  ;;  %v876_v57 = vld [vmem:[%s1273_s5 + $0xb0] sm:$0xf]  ;;  %v909_v58 = vld [vmem:[%s1273_s5 + $0xb8] sm:$0xf0] }
 0x159   : > { %v873_v59 = vor.u32 %v907_v54, %v870_v56  ;;  %v877_v60 = vor.u32 %v909_v58, %v876_v57  ;;  %v856_v61 = vld [vmem:[%s1273_s5 + $0x90] sm:$0xf]  ;;  %v905_v62 = vld [vmem:[%s1273_s5 + $0x98] sm:$0xf0]  ;;  %v904_v63 = vld [vmem:[%s1273_s5 + $0x94] sm:$0xf] }
 0x15a   : > { %620 = vmatpush.bf16.msra.mxu0 %v869_v55  ;;  %v857_v0 = vor.u32 %v905_v62, %v856_v61  ;;  %v858_v1 = vld [vmem:[%s1273_s5 + $0x9c] sm:$0xf0]  ;;  %v864_v2 = vld [vmem:[%s1273_s5 + $0x98] sm:$0xf]  ;;  %v906_v3 = vld [vmem:[%s1273_s5 + $0xa0] sm:$0xf0] }
 0x15b   : > { %633 = vmatpush.bf16.msra.mxu1 %v873_v59  ;;  %646 = vmatpush.bf16.msra.mxu2 %v877_v60  ;;  %v861_v4 = vor.u32 %v904_v63, %v858_v1  ;;  %v865_v5 = vor.u32 %v906_v3, %v864_v2  ;;  %v844_v6 = vld [vmem:[%s1273_s5 + $0x78] sm:$0xf]  ;;  %v902_v7 = vld [vmem:[%s1273_s5 + $0x80] sm:$0xf0]  ;;  %v901_v8 = vld [vmem:[%s1273_s5 + $0x7c] sm:$0xf] }
 0x15c   : > { %v846_v9 = vld [vmem:[%s1273_s5 + $0x84] sm:$0xf0]  ;;  %v852_v10 = vld [vmem:[%s1273_s5 + $0x80] sm:$0xf]  ;;  %v903_v11 = vld [vmem:[%s1273_s5 + $0x88] sm:$0xf0]  ;;  %v845_v12 = vor.u32 %v902_v7, %v844_v6 }
 0x15d   : > { %v849_v13 = vor.u32 %v901_v8, %v846_v9  ;;  %v853_v14 = vor.u32 %v903_v11, %v852_v10  ;;  %v832_v15 = vld [vmem:[%s1273_s5 + $0x60] sm:$0xf]  ;;  %v899_v16 = vld [vmem:[%s1273_s5 + $0x68] sm:$0xf0]  ;;  %v898_v17 = vld [vmem:[%s1273_s5 + $0x64] sm:$0xf]  ;;  %v669_v8 = vlaneseq }
 0x15e   : > { %621 = vmatpush.bf16.msra.mxu0 %v857_v0  ;;  %v834_v18 = vld [vmem:[%s1273_s5 + $0x6c] sm:$0xf0]  ;;  %v840_v19 = vld [vmem:[%s1273_s5 + $0x68] sm:$0xf]  ;;  %v900_v20 = vld [vmem:[%s1273_s5 + $0x70] sm:$0xf0]  ;;  %v833_v21 = vor.u32 %v899_v16, %v832_v15 }
 0x15f   : > { %634 = vmatpush.bf16.msra.mxu1 %v861_v4  ;;  %647 = vmatpush.bf16.msra.mxu2 %v865_v5  ;;  %v837_v22 = vor.u32 %v898_v17, %v834_v18  ;;  %v841_v23 = vor.u32 %v900_v20, %v840_v19  ;;  %v820_v24 = vld [vmem:[%s1273_s5 + $0x48] sm:$0xf]  ;;  %v896_v25 = vld [vmem:[%s1273_s5 + $0x50] sm:$0xf0]  ;;  %v895_v26 = vld [vmem:[%s1273_s5 + $0x4c] sm:$0xf] }
 0x160   : > { %v822_v27 = vld [vmem:[%s1273_s5 + $0x54] sm:$0xf0]  ;;  %v828_v28 = vld [vmem:[%s1273_s5 + $0x50] sm:$0xf]  ;;  %v897_v29 = vld [vmem:[%s1273_s5 + $0x58] sm:$0xf0]  ;;  %v821_v30 = vor.u32 %v896_v25, %v820_v24 }
 0x161   : > { %v825_v31 = vor.u32 %v895_v26, %v822_v27  ;;  %v829_v32 = vor.u32 %v897_v29, %v828_v28  ;;  %v808_v33 = vld [vmem:[%s1273_s5 + $0x30] sm:$0xf]  ;;  %v893_v34 = vld [vmem:[%s1273_s5 + $0x38] sm:$0xf0]  ;;  %v892_v35 = vld [vmem:[%s1273_s5 + $0x34] sm:$0xf] }
 0x162   : > { %622 = vmatpush.bf16.msra.mxu0 %v845_v12  ;;  %v810_v36 = vld [vmem:[%s1273_s5 + $0x3c] sm:$0xf0]  ;;  %v816_v37 = vld [vmem:[%s1273_s5 + $0x38] sm:$0xf]  ;;  %v894_v38 = vld [vmem:[%s1273_s5 + $0x40] sm:$0xf0]  ;;  %v809_v39 = vor.u32 %v893_v34, %v808_v33 }
 0x163   : > { %635 = vmatpush.bf16.msra.mxu1 %v849_v13  ;;  %648 = vmatpush.bf16.msra.mxu2 %v853_v14  ;;  %v813_v40 = vor.u32 %v892_v35, %v810_v36  ;;  %v817_v41 = vor.u32 %v894_v38, %v816_v37  ;;  %v796_v42 = vld [vmem:[%s1273_s5 + $0x18] sm:$0xf]  ;;  %v890_v43 = vld [vmem:[%s1273_s5 + $0x20] sm:$0xf0]  ;;  %v889_v44 = vld [vmem:[%s1273_s5 + $0x1c] sm:$0xf] }
 0x164   : > { %v798_v45 = vld [vmem:[%s1273_s5 + $0x24] sm:$0xf0]  ;;  %v804_v46 = vld [vmem:[%s1273_s5 + $0x20] sm:$0xf]  ;;  %v891_v47 = vld [vmem:[%s1273_s5 + $0x28] sm:$0xf0]  ;;  %v797_v48 = vor.u32 %v890_v43, %v796_v42 }
 0x165   : > { %v449_v49 = vld [vmem:[#allocation2] sm:$0x1]  ;;  %v801_v50 = vor.u32 %v889_v44, %v798_v45  ;;  %v805_v51 = vor.u32 %v891_v47, %v804_v46  ;;  %v887_v53 = vld [vmem:[%s1273_s5 + $0x8] sm:$0xf0]  ;;  %v886_v54 = vld [vmem:[%s1273_s5 + $0x4] sm:$0xf] }
 0x166   : > { %623 = vmatpush.bf16.msra.mxu0 %v833_v21  ;;  %v784_v52 = vld [vmem:[%s1273_s5] sm:$0xf]  ;;  %v786_v55 = vld [vmem:[%s1273_s5 + $0xc] sm:$0xf0]  ;;  %v792_v56 = vld [vmem:[%s1273_s5 + $0x8] sm:$0xf] }
 0x167   : > { %636 = vmatpush.bf16.msra.mxu1 %v837_v22  ;;  %649 = vmatpush.bf16.msra.mxu2 %v841_v23  ;;  %v888_v57 = vld [vmem:[%s1273_s5 + $0x10] sm:$0xf0]  ;;  %v450_v58 = vmul.f32 0.015625, %v449_v49  ;;  %v785_v59 = vor.u32 %v887_v53, %v784_v52  ;;  %v789_v60 = vor.u32 %v886_v54, %v786_v55  ;;  %v484_v63 = vld [vmem:[%s1274_s6] sm:$0x7]  ;;  %vm664_vm4 = vcmask 1040384  }
 0x168   : > { %v793_v61 = vor.u32 %v888_v57, %v792_v56  ;;  %v615_v0 = vperm.slane %v484_v63, 1  ;;  %v614_v2 = vperm.slane %v484_v63, 0  ;;  %v616_v5 = vperm.slane %v484_v63, 2 }
 0x169   : > { %v451_v62 = vpack.c.bf16 %v450_v58, %v450_v58  ;;  %vm666_vm5 = vcmask 1041408   ;;  %vm671_vm6 = vcmp.lt.s32.totalorder %v669_v8, 300 }
 0x16a   : > { %624 = vmatpush.bf16.msra.mxu0 %v821_v30 }
 0x16b   : > { %637 = vmatpush.bf16.msra.mxu1 %v825_v31  ;;  %650 = vmatpush.bf16.msra.mxu2 %v829_v32 }
 0x16e   : > { %625 = vmatpush.bf16.msra.mxu0 %v809_v39 }
 0x16f   : > { %638 = vmatpush.bf16.msra.mxu1 %v813_v40  ;;  %651 = vmatpush.bf16.msra.mxu2 %v817_v41 }
 0x172   : > { %626 = vmatpush.bf16.msra.mxu0 %v797_v48 }
 0x173   : > { %639 = vmatpush.bf16.msra.mxu1 %v801_v50  ;;  %652 = vmatpush.bf16.msra.mxu2 %v805_v51 }
 0x176   : > { %627 = vmatpush.bf16.msra.mxu0 %v785_v59 }
 0x177   : > { %640 = vmatpush.bf16.msra.mxu1 %v789_v60  ;;  %653 = vmatpush.bf16.msra.mxu2 %v793_v61 }
 0x179   : > { %628 = vmatmul.bf16.vlgmr.msra.gmra.mxu0 %v451_v62 }
 0x17a   : > { %641 = vmatmul.bf16.vlgmr.msra.gmra.mxu1 %v451_v62  ;;  %654 = vmatmul.bf16.vlgmr.msra.gmra.mxu2 %v451_v62 }
 0x1f6   : > { %v629_v1 = vpop.f32.mrf.mxu0 }
 0x1f7   : > { %v642_v3 = vpop.f32.mrf.mxu1  ;;  %v630_v6 = vadd.f32 %v629_v1, %v614_v2 }
 0x1f8   : > { %v643_v4 = vadd.f32 %v642_v3, %v615_v0 }
 0x1fa   : > { %v662_v7 = vrot.slane %v643_v4, 7 }
 0x1fc   : > { %v665_v12 = vsel %vm664_vm4, %v630_v6, %v662_v7 }
 0x1fd   : > { %v655_v9 = vpop.f32.mrf.mxu2 }
 0x1fe   : > { %v656_v10 = vadd.f32 %v655_v9, %v616_v5  ;;  %v631_v11 = vpop.f32.mrf.mxu0 }
 0x1ff   : > { %v644_v13 = vpop.f32.mrf.mxu1 }
 0x200   : > { %v663_v14 = vrot.slane %v656_v10, 6 }
 0x202   : > { %v667_v15 = vsel %vm666_vm5, %v665_v12, %v663_v14 }
 0x203   : > { %673 = vst.msk [vmem:[%s1077_s15] sm:$0x7] %vm671_vm6, %v667_v15 }
 0x205   : > { %v657_v16 = vpop.f32.mrf.mxu2 }
 0x206 PF: > { %s17_s28 = sadd.s32 1, %s997_s28   ;;  %s1276_s24 = smov %s989_s26 }
 0x207   : > { %p14_p9 = scmp.ge.s32.totalorder %s17_s28, 6   ;;  %s1277_s25 = smov %s993_s27 }
 0x208   : > { %s1278_s26 = smov %s1281_s29  ;;  %s1279_s27 = smov %s1285_s30 }
 0x209   :  { %16 = sbr.rel (!%p14_p9) target bundleno = 3 (0x3), region = 86 }

</bundles_post_ra>
